<compile_context>
chip_gen: v7x
topology: tpu7x:2x2x1
jax: 0.10.0
libtpu: 0.0.40
codegen_flags: <defaults>
</compile_context>

<pallas_src>
import functools

import jax
import jax.numpy as jnp
from jax.experimental import pallas as pl
from jax.experimental.pallas import tpu as pltpu

_LANE = 128
_SUBLANE = 8
_NUM_SPLITS = 2          # leading 'parallel' grid axis (v7x has 2 TensorCores)


def _round_up(x, m):
    return (x + m - 1) // m * m


def _cdiv(a, b):
    return -(-a // b)


def _derive_tiles(n, c, r, logit_itemsize, w_itemsize, vmem_budget_bytes):
    """Pick (tn, tr) so double-buffered logits + labels + weights fit the budget."""
    c_lanes = _round_up(c, _LANE)                     # VMEM lane padding of logits
    # Weight tile: ~1 MiB per buffer of lane-dense rows, balanced to minimize padding.
    r8 = _round_up(max(r, _SUBLANE), _SUBLANE)
    tr_target = max(_SUBLANE, ((1 << 20) // (_LANE * w_itemsize)) // _SUBLANE * _SUBLANE)
    tr = min(r8, tr_target)
    tr = _round_up(_cdiv(r8, _cdiv(r8, tr)), _SUBLANE)
    w_bytes = 2 * tr * _LANE * w_itemsize             # double-buffered
    # Logits (+ lane-padded int32 labels): fill the remaining budget, double-buffered.
    per_row = c_lanes * logit_itemsize + _LANE * 4
    avail = max(vmem_budget_bytes - w_bytes, 2 * _SUBLANE * per_row)
    tn = max(_SUBLANE, ((avail // 2) // per_row) // _SUBLANE * _SUBLANE)
    n8 = _round_up(max(n, 1), _SUBLANE)
    if tn >= n8:
        tn = n8
    else:
        tn = _round_up(_cdiv(n8, _cdiv(n8, tn)), _SUBLANE)   # balance tiles
    return tn, tr


def _loss_kernel(logits_ref, labels_ref, w_ref, out_ref, ce_acc, w_acc, *,
                 n_valid, tn, nb, nb0, nw, nw0, inv_n, l2_coef):
    p = pl.program_id(0)            # core-split index
    i = pl.program_id(1)            # reduction step within this split
    last = pl.num_programs(1) - 1

    @pl.when(i == 0)
    def _():
        ce_acc[...] = jnp.zeros_like(ce_acc)
        w_acc[...] = jnp.zeros_like(w_acc)

    # ---- cross-entropy partial sum for this split's batch tile --------------
    bt = p * nb0 + i                # global batch-tile index

    @pl.when(jnp.logical_and(i < nb0, bt < nb))
    def _():
        x = logits_ref[...].astype(jnp.float32)              # [TN, C] (bf16 -> f32 here)
        labels = labels_ref[...]                              # [TN, 1] int32
        tn_, c = x.shape

        # target logit via iota == label (no one-hot, VPU only)
        class_ids = jax.lax.broadcasted_iota(jnp.int32, (tn_, c), 1)
        tgt = jnp.sum(jnp.where(class_ids == labels, x, 0.0),
                      axis=-1, keepdims=True)                 # [TN, 1]

        # numerically-stable logsumexp
        row_max = jnp.max(x, axis=-1, keepdims=True)
        lse = jnp.log(jnp.sum(jnp.exp(x - row_max), axis=-1, keepdims=True)) + row_max

        # mask padded batch rows
        row_ids = jax.lax.broadcasted_iota(jnp.int32, (tn_, 1), 0) + bt * tn
        contrib = jnp.where(row_ids < n_valid, lse - tgt, 0.0)   # [TN, 1]

        # Fold rows with element-wise VALU adds only (no per-step XLU-to-scalar).
        ce_acc[...] += jnp.sum(contrib.reshape(tn_ // _SUBLANE, _SUBLANE, 1), axis=0)

    # ---- L2 partial sum for this split's weight-slab tile --------------------
    wt = p * nw0 + i                # global weight-tile index

    @pl.when(jnp.logical_and(i < nw0, wt < nw))
    def _():
        w = w_ref[...].astype(jnp.float32)                    # [TR, 128], zero-padded
        sq = w * w
        tr_ = sq.shape[0]
        w_acc[...] += jnp.sum(sq.reshape(tr_ // _SUBLANE, _SUBLANE, _LANE), axis=0)

    # ---- finalize: the only cross-lane reduce + combine ----------------------
    @pl.when(i == last)
    def _():
        ce_part = jnp.sum(ce_acc[...], axis=(0, 1), keepdims=True)   # (1, 1)
        w_part = jnp.sum(w_acc[...], axis=(0, 1), keepdims=True)     # (1, 1)
        total = ce_part * inv_n + l2_coef * w_part
        out_ref[...] = jnp.broadcast_to(total, out_ref.shape)        # lane-dense store


def build_weight_slab(weight_tensors, dtype=jnp.bfloat16):
    """Pack all '*weight*' parameters into one lane-dense [R, 128] slab.

    Build ONCE per parameter update (these are parameters, not activations) and
    reuse across loss calls. bf16 storage halves the L2 stream's HBM bytes; the
    square + accumulate runs in f32 inside the kernel. Zero padding does not
    perturb sum(w**2).
    """
    if not weight_tensors:
        return jnp.zeros((_SUBLANE, _LANE), dtype)
    flat = jnp.concatenate([jnp.ravel(w).astype(dtype) for w in weight_tensors])
    pad = (-flat.size) % (_SUBLANE * _LANE)
    if pad:
        flat = jnp.pad(flat, (0, pad))
    return flat.reshape(-1, _LANE)


def cross_entropy_l2(y_pred, y_test, w_slab, *, m, l2_ratio,
                     vmem_budget_bytes=24 * 1024 * 1024):
    """Pallas implementation of CrossEntropy_L2.forward.

    y_pred: [N, C] logits (native dtype, e.g. bf16 or f32; NOT pre-cast)
    y_test: [N]    int class indices
    w_slab: [R, 128] slab from build_weight_slab (built once, reused)
    """
    n, c = y_pred.shape
    if w_slab.ndim != 2 or w_slab.shape[1] != _LANE:
        raise ValueError("w_slab must be [R, 128]; use build_weight_slab().")
    if w_slab.shape[0] == 0:                 # no '*weight*' params: L2 term is 0
        w_slab = jnp.zeros((_SUBLANE, _LANE), w_slab.dtype)
    r = w_slab.shape[0]

    tn, tr = _derive_tiles(n, c, r, y_pred.dtype.itemsize, w_slab.dtype.itemsize,
                           vmem_budget_bytes)

    padded_n = _round_up(n, tn)
    padded_r = _round_up(r, tr)
    if padded_n != n:
        y_pred = jnp.pad(y_pred, ((0, padded_n - n), (0, 0)))
        y_test = jnp.pad(y_test, (0, padded_n - n), constant_values=-1)
    if padded_r != r:
        w_slab = jnp.pad(w_slab, ((0, padded_r - r), (0, 0)))

    labels2d = y_test.astype(jnp.int32).reshape(padded_n, 1)

    nb = padded_n // tn                      # batch tiles
    nw = padded_r // tr                      # weight tiles
    nb0 = _cdiv(nb, _NUM_SPLITS)             # batch tiles owned by split 0
    nw0 = _cdiv(nw, _NUM_SPLITS)             # weight tiles owned by split 0
    steps = max(nb0, nw0)

    kernel = functools.partial(
        _loss_kernel,
        n_valid=n, tn=tn, nb=nb, nb0=nb0, nw=nw, nw0=nw0,
        inv_n=1.0 / float(n),
        l2_coef=float(l2_ratio) / float(m) / 2.0,
    )

    cost = pl.CostEstimate(
        flops=int(5 * padded_n * c + 3 * padded_r * _LANE),
        transcendentals=int(padded_n * c),
        bytes_accessed=int(padded_n * c * y_pred.dtype.itemsize
                           + padded_n * 4
                           + padded_r * _LANE * w_slab.dtype.itemsize
                           + _NUM_SPLITS * _LANE * 4),
    )

    out = pl.pallas_call(
        kernel,
        out_shape=jax.ShapeDtypeStruct((1, _NUM_SPLITS * _LANE), jnp.float32),
        grid_spec=pltpu.PrefetchScalarGridSpec(
            num_scalar_prefetch=0,
            grid=(_NUM_SPLITS, steps),
            in_specs=[
                # logits: this split's batch tiles; clamp once its CE side is done
                pl.BlockSpec((tn, c),
                             lambda p, i: (jnp.minimum(p * nb0 + i, nb - 1), 0)),
                # labels: tiny [TN, 1] int32 tile alongside the logits
                pl.BlockSpec((tn, 1),
                             lambda p, i: (jnp.minimum(p * nb0 + i, nb - 1), 0)),
                # weight slab: this split's row tiles; clamp once its L2 side is done
                pl.BlockSpec((tr, _LANE),
                             lambda p, i: (jnp.minimum(p * nw0 + i, nw - 1), 0)),
            ],
            # per-split partial written to its own lane-dense 128-wide block
            out_specs=pl.BlockSpec((1, _LANE), lambda p, i: (0, p)),
            scratch_shapes=[
                pltpu.VMEM((_SUBLANE, 1), jnp.float32),      # CE partial sums
                pltpu.VMEM((_SUBLANE, _LANE), jnp.float32),  # sum(w**2) partial sums
            ],
        ),
        compiler_params=pltpu.CompilerParams(
            dimension_semantics=("parallel", "arbitrary"),
            vmem_limit_bytes=int(vmem_budget_bytes + (8 << 20)),
        ),
        cost_estimate=cost,
    )(y_pred, labels2d, w_slab)

    # Sum the per-split partials (both loss terms are linear in their partials).
    return jnp.sum(out[0, ::_LANE])


if __name__ == "__main__":
    key = jax.random.PRNGKey(0)
    k1, k2, k3, k4 = jax.random.split(key, 4)

    # Small shapes consistent with the forward: logits [N, C], targets [N].
    N, C = 8, 16
    y_pred = jax.random.normal(k1, (N, C), dtype=jnp.float32)
    y_test = jax.random.randint(k2, (N,), 0, C, dtype=jnp.int32)

    # Deterministic synthetic "model" weights (state_dict entries whose name
    # contains 'weight'); biases would be excluded so none are included.
    w_fc1 = jax.random.normal(k3, (32, 64), dtype=jnp.float32) * 0.1   # fc1.weight
    w_fc2 = jax.random.normal(k4, (16, 32), dtype=jnp.float32) * 0.1   # fc2.weight
    weights = [w_fc1, w_fc2]

    m_samples = 100       # self.m
    l2_ratio = 1e-3       # self.l2_ratio

    # Built ONCE outside the per-step loss (parameters, not activations).
    w_slab = build_weight_slab(weights)

    loss = cross_entropy_l2(y_pred, y_test, w_slab, m=m_samples, l2_ratio=l2_ratio)
    loss = jax.block_until_ready(loss)

    # Pure-JAX reference check.
    logp = jax.nn.log_softmax(y_pred.astype(jnp.float32), axis=-1)
    ce_ref = -jnp.mean(logp[jnp.arange(N), y_test])
    wsum = sum(jnp.sum(jnp.square(w.astype(jnp.float32))) for w in weights)
    ref = ce_ref + l2_ratio * wsum / m_samples / 2.0
    assert jnp.allclose(loss, ref, rtol=1e-5, atol=1e-5), (loss, ref)

    print("KERNEL_OK")
</pallas_src>

<mosaic_0001>
module attributes {stable_mosaic.version = 11 : i64} {
  func.func @_loss_kernel(%arg0: i32, %arg1: i32, %arg2: memref<8x16xf32, #tpu.memory_space<vmem>>, %arg3: memref<8x1xi32, #tpu.memory_space<vmem>>, %arg4: memref<24x128xbf16, #tpu.memory_space<vmem>>, %arg5: memref<1x128xf32, #tpu.memory_space<vmem>>, %arg6: memref<8x1xf32, #tpu.memory_space<vmem>>, %arg7: memref<8x128xf32, #tpu.memory_space<vmem>>) attributes {dimension_semantics = [#tpu.dimension_semantics<parallel>, #tpu.dimension_semantics<arbitrary>], iteration_bounds = array<i64: 2, 1>, scalar_prefetch = 0 : i64, scratch_operands = 2 : i64, tpu.core_type = #tpu.core_type<tc>, window_params = [{transform_indices = @transform_0, window_bounds = array<i64: 8, 16>}, {transform_indices = @transform_1, window_bounds = array<i64: 8, 1>}, {transform_indices = @transform_2, window_bounds = array<i64: 24, 128>}, {transform_indices = @transform_3, window_bounds = array<i64: 1, 128>}]} {
    %c0_i32 = arith.constant 0 : i32
    %0 = arith.cmpi eq, %arg1, %c0_i32 : i32
    %1 = arith.extui %0 : i1 to i32
    %c0_i32_0 = arith.constant 0 : i32
    %2 = arith.cmpi ne, %1, %c0_i32_0 : i32
    scf.if %2 {
      %cst = arith.constant 0.000000e+00 : f32
      %20 = vector.broadcast %cst : f32 to vector<8x1xf32>
      %c0 = arith.constant 0 : index
      %c0_10 = arith.constant 0 : index
      %21 = vector.load %arg6[%c0, %c0_10] : memref<8x1xf32, #tpu.memory_space<vmem>>, vector<8x1xf32>
      tpu.vector_store %arg6[%c0, %c0_10], %20 {strides = array<i32>} : memref<8x1xf32, #tpu.memory_space<vmem>>, vector<8x1xf32>,
      %cst_11 = arith.constant 0.000000e+00 : f32
      %22 = vector.broadcast %cst_11 : f32 to vector<8x128xf32>
      %c0_12 = arith.constant 0 : index
      %c0_13 = arith.constant 0 : index
      %23 = vector.load %arg7[%c0_12, %c0_13] : memref<8x128xf32, #tpu.memory_space<vmem>>, vector<8x128xf32>
      tpu.vector_store %arg7[%c0_12, %c0_13], %22 {strides = array<i32>} : memref<8x128xf32, #tpu.memory_space<vmem>>, vector<8x128xf32>,
    } else {
    }
    %c1_i32 = arith.constant 1 : i32
    %3 = arith.muli %arg0, %c1_i32 : i32
    %4 = arith.addi %3, %arg1 : i32
    %c1_i32_1 = arith.constant 1 : i32
    %5 = arith.cmpi slt, %arg1, %c1_i32_1 : i32
    %c1_i32_2 = arith.constant 1 : i32
    %6 = arith.cmpi slt, %4, %c1_i32_2 : i32
    %7 = arith.andi %5, %6 : i1
    %8 = arith.extui %7 : i1 to i32
    %c0_i32_3 = arith.constant 0 : i32
    %9 = arith.cmpi ne, %8, %c0_i32_3 : i32
    scf.if %9 {
      %c0 = arith.constant 0 : index
      %c0_10 = arith.constant 0 : index
      %20 = vector.load %arg2[%c0, %c0_10] : memref<8x16xf32, #tpu.memory_space<vmem>>, vector<8x16xf32>
      %c0_11 = arith.constant 0 : index
      %c0_12 = arith.constant 0 : index
      %21 = vector.load %arg3[%c0_11, %c0_12] : memref<8x1xi32, #tpu.memory_space<vmem>>, vector<8x1xi32>
      %22 = tpu.iota {dimensions = array<i32: 1>} : vector<8x16xi32>
      %23 = vector.broadcast %21 : vector<8x1xi32> to vector<8x16xi32>
      %24 = arith.cmpi eq, %22, %23 : vector<8x16xi32>
      %cst = arith.constant 0.000000e+00 : f32
      %25 = vector.broadcast %cst : f32 to vector<8x16xf32>
      %26 = arith.select %24, %20, %25 : vector<8x16xi1>, vector<8x16xf32>
      %cst_13 = arith.constant dense<0.000000e+00> : vector<8xf32>
      %27 = vector.multi_reduction <add>, %26, %cst_13 [1] : vector<8x16xf32> to vector<8xf32>
      %28 = vector.shape_cast %27 : vector<8xf32> to vector<8x1xf32>
      %cst_14 = arith.constant dense<0xFF800000> : vector<8xf32>
      %29 = vector.multi_reduction <maximumf>, %20, %cst_14 [1] : vector<8x16xf32> to vector<8xf32>
      %30 = vector.shape_cast %29 : vector<8xf32> to vector<8x1xf32>
      %31 = vector.broadcast %30 : vector<8x1xf32> to vector<8x16xf32>
      %32 = arith.subf %20, %31 : vector<8x16xf32>
      %33 = math.exp %32 : vector<8x16xf32>
      %cst_15 = arith.constant dense<0.000000e+00> : vector<8xf32>
      %34 = vector.multi_reduction <add>, %33, %cst_15 [1] : vector<8x16xf32> to vector<8xf32>
      %35 = vector.shape_cast %34 : vector<8xf32> to vector<8x1xf32>
      %36 = math.log %35 : vector<8x1xf32>
      %37 = arith.addf %36, %30 : vector<8x1xf32>
      %38 = tpu.iota {dimensions = array<i32: 0>} : vector<8x1xi32>
      %c8_i32 = arith.constant 8 : i32
      %39 = arith.muli %4, %c8_i32 : i32
      %40 = vector.broadcast %39 : i32 to vector<8x1xi32>
      %41 = arith.addi %38, %40 : vector<8x1xi32>
      %c8_i32_16 = arith.constant 8 : i32
      %42 = vector.broadcast %c8_i32_16 : i32 to vector<8x1xi32>
      %43 = arith.cmpi slt, %41, %42 : vector<8x1xi32>
      %44 = arith.subf %37, %28 : vector<8x1xf32>
      %cst_17 = arith.constant 0.000000e+00 : f32
      %45 = vector.broadcast %cst_17 : f32 to vector<8x1xf32>
      %46 = arith.select %43, %44, %45 : vector<8x1xi1>, vector<8x1xf32>
      %c0_18 = arith.constant 0 : index
      %c0_19 = arith.constant 0 : index
      %47 = vector.load %arg6[%c0_18, %c0_19] : memref<8x1xf32, #tpu.memory_space<vmem>>, vector<8x1xf32>
      %48 = vector.shape_cast %46 : vector<8x1xf32> to vector<1x8x1xf32>
      %cst_20 = arith.constant dense<0.000000e+00> : vector<8x1xf32>
      %49 = vector.multi_reduction <add>, %48, %cst_20 [0] : vector<1x8x1xf32> to vector<8x1xf32>
      %50 = arith.addf %47, %49 : vector<8x1xf32>
      %c0_21 = arith.constant 0 : index
      %c0_22 = arith.constant 0 : index
      %51 = vector.load %arg6[%c0_21, %c0_22] : memref<8x1xf32, #tpu.memory_space<vmem>>, vector<8x1xf32>
      tpu.vector_store %arg6[%c0_21, %c0_22], %50 {strides = array<i32>} : memref<8x1xf32, #tpu.memory_space<vmem>>, vector<8x1xf32>,
    } else {
    }
    %c1_i32_4 = arith.constant 1 : i32
    %10 = arith.muli %arg0, %c1_i32_4 : i32
    %11 = arith.addi %10, %arg1 : i32
    %c1_i32_5 = arith.constant 1 : i32
    %12 = arith.cmpi slt, %arg1, %c1_i32_5 : i32
    %c1_i32_6 = arith.constant 1 : i32
    %13 = arith.cmpi slt, %11, %c1_i32_6 : i32
    %14 = arith.andi %12, %13 : i1
    %15 = arith.extui %14 : i1 to i32
    %c0_i32_7 = arith.constant 0 : i32
    %16 = arith.cmpi ne, %15, %c0_i32_7 : i32
    scf.if %16 {
      %c0 = arith.constant 0 : index
      %c0_10 = arith.constant 0 : index
      %20 = vector.load %arg4[%c0, %c0_10] : memref<24x128xbf16, #tpu.memory_space<vmem>>, vector<24x128xbf16>
      %21 = arith.extf %20 : vector<24x128xbf16> to vector<24x128xf32>
      %22 = arith.mulf %21, %21 : vector<24x128xf32>
      %c0_11 = arith.constant 0 : index
      %c0_12 = arith.constant 0 : index
      %23 = vector.load %arg7[%c0_11, %c0_12] : memref<8x128xf32, #tpu.memory_space<vmem>>, vector<8x128xf32>
      %24 = vector.shape_cast %22 : vector<24x128xf32> to vector<3x8x128xf32>
      %cst = arith.constant dense<0.000000e+00> : vector<8x128xf32>
      %25 = vector.multi_reduction <add>, %24, %cst [0] : vector<3x8x128xf32> to vector<8x128xf32>
      %26 = arith.addf %23, %25 : vector<8x128xf32>
      %c0_13 = arith.constant 0 : index
      %c0_14 = arith.constant 0 : index
      %27 = vector.load %arg7[%c0_13, %c0_14] : memref<8x128xf32, #tpu.memory_space<vmem>>, vector<8x128xf32>
      tpu.vector_store %arg7[%c0_13, %c0_14], %26 {strides = array<i32>} : memref<8x128xf32, #tpu.memory_space<vmem>>, vector<8x128xf32>,
    } else {
    }
    %c0_i32_8 = arith.constant 0 : i32
    %17 = arith.cmpi eq, %arg1, %c0_i32_8 : i32
    %18 = arith.extui %17 : i1 to i32
    %c0_i32_9 = arith.constant 0 : i32
    %19 = arith.cmpi ne, %18, %c0_i32_9 : i32
    scf.if %19 {
      %c0 = arith.constant 0 : index
      %c0_10 = arith.constant 0 : index
      %20 = vector.load %arg6[%c0, %c0_10] : memref<8x1xf32, #tpu.memory_space<vmem>>, vector<8x1xf32>
      %21 = vector.shape_cast %20 : vector<8x1xf32> to vector<1x8x1xf32>
      %cst = arith.constant dense<0.000000e+00> : vector<1xf32>
      %22 = vector.multi_reduction <add>, %21, %cst [1, 2] : vector<1x8x1xf32> to vector<1xf32>
      %23 = vector.shape_cast %22 : vector<1xf32> to vector<1x1x1xf32>
      %24 = vector.extract %23[0, 0, 0] : f32 from vector<1x1x1xf32>
      %25 = vector.broadcast %24 : f32 to vector<1x1xf32>
      %c0_11 = arith.constant 0 : index
      %c0_12 = arith.constant 0 : index
      %26 = vector.load %arg7[%c0_11, %c0_12] : memref<8x128xf32, #tpu.memory_space<vmem>>, vector<8x128xf32>
      %27 = vector.shape_cast %26 : vector<8x128xf32> to vector<1x8x128xf32>
      %cst_13 = arith.constant dense<0.000000e+00> : vector<1xf32>
      %28 = vector.multi_reduction <add>, %27, %cst_13 [1, 2] : vector<1x8x128xf32> to vector<1xf32>
      %29 = vector.shape_cast %28 : vector<1xf32> to vector<1x1x1xf32>
      %30 = vector.extract %29[0, 0, 0] : f32 from vector<1x1x1xf32>
      %31 = vector.broadcast %30 : f32 to vector<1x1xf32>
      %cst_14 = arith.constant 1.250000e-01 : f32
      %32 = vector.broadcast %cst_14 : f32 to vector<1x1xf32>
      %33 = arith.mulf %25, %32 : vector<1x1xf32>
      %cst_15 = arith.constant 5.000000e-06 : f32
      %34 = vector.broadcast %cst_15 : f32 to vector<1x1xf32>
      %35 = arith.mulf %34, %31 : vector<1x1xf32>
      %36 = arith.addf %33, %35 : vector<1x1xf32>
      %37 = vector.shape_cast %36 : vector<1x1xf32> to vector<1x1xf32>
      %38 = vector.broadcast %37 : vector<1x1xf32> to vector<1x128xf32>
      %c0_16 = arith.constant 0 : index
      %c0_17 = arith.constant 0 : index
      %39 = vector.load %arg5[%c0_16, %c0_17] : memref<1x128xf32, #tpu.memory_space<vmem>>, vector<1x128xf32>
      tpu.vector_store %arg5[%c0_16, %c0_17], %38 {strides = array<i32>} : memref<1x128xf32, #tpu.memory_space<vmem>>, vector<1x128xf32>,
    } else {
    }
    return
  }
  func.func @transform_0(%arg0: i32, %arg1: i32) -> (i32, i32) {
    %c1_i32 = arith.constant 1 : i32
    %0 = arith.muli %arg0, %c1_i32 : i32
    %1 = arith.addi %0, %arg1 : i32
    %c0_i32 = arith.constant 0 : i32
    %2 = arith.minsi %1, %c0_i32 : i32
    %c0_i32_0 = arith.constant 0 : i32
    %c0_i32_1 = arith.constant 0 : i32
    return %2, %c0_i32_0 : i32, i32
  }
  func.func @transform_1(%arg0: i32, %arg1: i32) -> (i32, i32) {
    %c1_i32 = arith.constant 1 : i32
    %0 = arith.muli %arg0, %c1_i32 : i32
    %1 = arith.addi %0, %arg1 : i32
    %c0_i32 = arith.constant 0 : i32
    %2 = arith.minsi %1, %c0_i32 : i32
    %c0_i32_0 = arith.constant 0 : i32
    %c0_i32_1 = arith.constant 0 : i32
    return %2, %c0_i32_0 : i32, i32
  }
  func.func @transform_2(%arg0: i32, %arg1: i32) -> (i32, i32) {
    %c1_i32 = arith.constant 1 : i32
    %0 = arith.muli %arg0, %c1_i32 : i32
    %1 = arith.addi %0, %arg1 : i32
    %c0_i32 = arith.constant 0 : i32
    %2 = arith.minsi %1, %c0_i32 : i32
    %c0_i32_0 = arith.constant 0 : i32
    %c0_i32_1 = arith.constant 0 : i32
    return %2, %c0_i32_0 : i32, i32
  }
  func.func @transform_3(%arg0: i32, %arg1: i32) -> (i32, i32) {
    %c0_i32 = arith.constant 0 : i32
    %c0_i32_0 = arith.constant 0 : i32
    return %c0_i32, %arg0 : i32, i32
  }
}

</mosaic_0001>

<bundles_post_ra>
// kernel: tpu_custom_call.1
= control target key start
LH: loop header
LB: loop body
LE: loop exit
PB: predicated region body
PF: predicated region fallthrough
CT: control target
= control target key end

     0   :  { %8 = vsyncpa [#allocation5], 0  ;;  %s966_s0 = inlined_call_operand.hbm [shape: f32[8,16], index: 0, kind: input, shape index: {}]   ;;  %s967_s1 = inlined_call_operand.vmem [shape: s32[8,1], index: 1, kind: input, shape index: {}]   ;;  %s968_s2 = inlined_call_operand.vmem [shape: bf16[24,128], index: 2, kind: input, shape index: {}]   ;;  %s969_s3 = inlined_call_operand.hbm [shape: f32[1,256], index: 3, kind: output, shape index: {}]  }
   0x1   :  { %10 = vsyncpa [#allocation5 + $0x1], 0 }
   0x2   :  { %11 = vsyncpa [#allocation6], 0 }
   0x3   :  { %13 = vsyncpa [#allocation6 + $0x1], 0  ;;  %s777_s12 = smov 0   ;;  %s779_s13 = smov 0  }
   0x4   :  { %s781_s14 = smov 0   ;;  %s783_s15 = smov 0  }
   0x5   :  { %s785_s16 = smov 0   ;;  %s787_s17 = smov 0  }
   0x6   :  { %s789_s18 = smov 0   ;;  %s791_s19 = smov 0  }
   0x7 LB: > { %s498_s20 = sadd.s32 4294967295, %s751_s19   ;;  %s499_s21 = sadd.s32 4294967294, %s751_s19   ;;  %s751_s19 = sphi %s791_s19, %s19_s19   ;;  %s747_s18 = sphi %s789_s18, %s990_s18   ;;  %s743_s17 = sphi %s787_s17, %s989_s17   ;;  %s739_s16 = sphi %s785_s16, %s956_s16   ;;  %s735_s15 = sphi %s783_s15, %s988_s15   ;;  %s731_s14 = sphi %s781_s14, %s987_s14   ;;  %s727_s13 = sphi %s779_s13, %s986_s13   ;;  %s723_s12 = sphi %s777_s12, %s985_s12  }
   0x8   : > { %s31_s22 = sadd.s32 1, %s747_s18  ;;  %p720_p1 = scmp.ne.s32.totalorder %s739_s16, 0 }
   0x9   : > { %p33_p0 = scmp.ge.s32.totalorder %s31_s22, 2  ;;  %p52_p2 = scmp.eq.s32.totalorder %s751_s19, 0 }
   0xa   : > { %p57_p3 = scmp.ne.s32.totalorder %s739_s16, %s735_s15  ;;  %p58_p5 = scmp.eq.s32.totalorder %s498_s20, 0 }
   0xb   : > { %s992_s22 = smov (%p33_p0, %s31_s22), 0  ;;  %p823_p4 = por %p720_p1, %p52_p2 }
   0xc   : > { %p827_p6 = por %p58_p5, %p57_p3  ;;  %s131_s25 = ssub.s32 %s747_s18, %s992_s22 }
   0xd   : > { %p132_p7 = scmp.eq.s32.totalorder %s131_s25, 0  ;;  %s134_s26 = sadd.s32 1, %s731_s14 }
   0xe   : > { %s974_s24 = scalar_select %p827_p6, 1, 0 }
   0xf   : > { %s835_s27 = scalar_select %p132_p7, %s731_s14, %s134_s26  }
  0x10   : > { %p144_p8 = scmp.ne.s32.totalorder %s731_s14, %s727_s13  ;;  %p145_p9 = scmp.eq.s32.totalorder %s498_s20, 1 }
  0x11   : > { %p150_p10 = scmp.ne.s32.totalorder %s727_s13, %s723_s12  ;;  %p151_p11 = scmp.eq.s32.totalorder %s499_s21, 1 }
  0x12   : > { %p841_p12 = por %p145_p9, %p144_p8  ;;  %p537_p1 = scmp.lt.s32.totalorder %s751_s19, 2 }
  0x13   : > { %p846_p0 = por %p151_p11, %p150_p10  ;;  %s753_s30 = smov [#allocation4]  }
  0x14   : > { %s975_s28 = scalar_select %p841_p12, 1, 0 }
  0x15   : > { %s976_s29 = scalar_select %p846_p0, 1, 0 }
  0x16   : > { %s185_s4 = sshll.u32 %s753_s30, 4  ;;  %p853_p2 = pnand %p537_p1, %p823_p4  ;;  %s186_s4 = int_to_ptr.vmem [resolvable:$true] %s185_s4 }
  0x17   : > { %s618_s8 = scalar_lea.hbm %s966_s0, 128 }
  0x18   : > { %s977_s5 = scalar_select %p853_p2, 1, 0 }
  0x19   : > { %p619_p7 = scmp.ne.s32.totalorder %s966_s0, %s618_s8  ;;  %p620_p8 = pneg %p853_p2 }
  0x1a   : > { %p625_p4 = scmp.lt.u32.totalorder %s618_s8, %s618_s8  ;;  %p627_p11 = scmp.lt.u32.totalorder %s618_s8, %s966_s0 }
  0x1b   : > { %p621_p9 = pnand %p620_p8, %p619_p7 }
  0x1c   : > { %p628_p1 = por %p627_p11, %p625_p4 }
  0x1d   : > { %p622_p10 = pneg %p621_p9 }
  0x1f   : > { %p629_p13 = pnand %p628_p1, %p622_p10 }
  0x21   : > { %632 = shalt.err (!%p629_p13)
}
  0x22   : > { %s633_s20 = scalar_lea.vmem %s186_s4, 128  ;;  %s640_s21 = scalar_lea.vmem %s186_s4, 256 }
  0x23   : > { %p634_p3 = scmp.ne.s32.totalorder %s186_s4, %s633_s20  ;;  %p641_p12 = scmp.lt.s32.totalorder %s186_s4, %s186_s4 }
  0x24   : > { %p642_p6 = scmp.lt.s32.totalorder %s640_s21, %s633_s20 }
  0x25   : > { %p636_p5 = pnand %p634_p3, %p620_p8 }
  0x26   : > { %p643_p2 = por %p642_p6, %p641_p12 }
  0x27   : > { %p637_p0 = pneg %p636_p5 }
  0x29   : > { %p644_p7 = pnand %p643_p2, %p637_p0 }
  0x2b   : > { %647 = shalt.err (!%p644_p7)
}
  0x2c   : > { %p978_p9 = scmp.ne.s32.totalorder %s977_s5, 0  ;;  %p979_p10 = scmp.lt.s32.totalorder %s751_s19, 3 }
  0x2d   : > { %p980_p13 = scmp.ge.s32.totalorder %s751_s19, 1 }
  0x2e   : > { %532 = dma.hbm_to_vmem [thread:$0]  (!%p978_p9), %s966_s0, 128, %s186_s4, [#allocation5]  }
  0x2f   : > { %p219_p4 = pnand %p980_p13, %p979_p10 }
  0x30   : > { %s224_s26 = sand.u32 (!%p219_p4), 1, %s739_s16   ;;  %p981_p6 = scmp.ne.s32.totalorder (!%p219_p4), %s974_s24, 0 }
  0x31   : > { %222 = sbr.rel (%p219_p4) target bundleno = 619 (0x26b), region = 32  ;;  %s505_s30 = sshll.u32 (!%p219_p4), %s224_s26, 3 }
  0x32   : > { %s225_s6 = scalar_lea.sflag (!%p219_p4), [#allocation5], %s224_s26  ;;  %s228_s7 = scalar_lea.vmem (!%p219_p4), [#allocation4], %s505_s30 }
  0x38   : > { %713 = dma.done.wait (%p981_p6), %s225_s6, 128  }
  0x39   : > { %715 = vsyncadd (%p981_p6), %s225_s6, 4294967168  ;;  %s263_s4 = sand.u32 1, %s727_s13   ;;  %p269_p12 = scmp.lt.s32.totalorder %s743_s17, 0  ;;  %vm294_vm0 = vcmask 7168   ;;  %v754_v0 = vmov 0.0  }
  0x3a   : > { %295 = vst.msk [vmem:[#allocation2] sm:$0xff] %vm294_vm0, %v754_v0  ;;  %296 = vst [vmem:[#allocation3] sm:$0xff] %v754_v0  ;;  %p299_p0 = scmp.lt.s32.totalorder %s743_s17, 1  ;;  %s897_s26 = scalar_lea.vmem [#allocation7], %s263_s4 }
  0x3b   : > { %s270_s5 = scalar_select %p269_p12, %s743_s17, 0 }
  0x3c   : > { %v304_v1 = vld [vmem:[%s228_s7] sm:$0xff] (%p299_p0)  ;;  %vm313_vm1 = vcmask (%p299_p0), 130048   ;;  %v755_v3 = vmov (%p299_p0), 0   ;;  %v306_v8 = vlaneseq (%p299_p0)  ;;  %s512_s30 = sshll.u32 (%p299_p0), %s743_s17, 3 }
  0x3d   : > { %s272_s8 = scalar_select %p269_p12, %s270_s5, 0 }
  0x3e   : > { %s281_s9 = smul.u32 3, %s270_s5  ;;  %v317_v2 = vsel (%p299_p0), %vm313_vm1, %v304_v1, -inf  ;;  %613 = vset.pattern.permute.xlu0 (%p299_p0), %v755_v3  ;;  %v307_v9 = vand.u32 (%p299_p0), 127, %v306_v8  ;;  %v330_v28 = vshrl.u32 (%p299_p0), %v306_v8, 7  ;;  %v332_v29 = vstv (%p299_p0), %s512_s30 }
  0x3f   : > { %s509_s10 = sshll.u32 %s272_s8, 3  ;;  %303 = sbr.rel (!%p299_p0) target bundleno = 384 (0x180), region = 44  ;;  %318 = vmax.xlane.f32.xlu0 (%p299_p0), %v317_v2 }
  0x40   : > { %s274_s15 = scalar_lea.vmem %s967_s1, %s509_s10  ;;  %p282_p2 = scmp.lt.s32.totalorder %s281_s9, 2  ;;  %v333_v31 = vadd.s32 (%p299_p0), %v332_v29, %v330_v28 }
  0x41   : > { %v305_v4 = vld [vmem:[%s274_s15] sm:$0xff] (%p299_p0)  ;;  %v351_v25 = vld [vmem:[#allocation3] sm:$0xff] (%p299_p0) }
  0x42   : > { %s994_s9 = smov (!%p282_p2, %s281_s9), 2  ;;  %vm334_vm3 = vcmp.lt.s32.totalorder (%p299_p0), %v333_v31, 8  ;;  %v337_v35 = vld [vmem:[#allocation2] sm:$0xff] (%p299_p0) }
  0x43   : > { %s510_s20 = sshll.u32 %s994_s9, 2 }
  0x44   : > { %s285_s25 = scalar_lea.vmem %s968_s2, %s510_s20 }
  0x45   : > { %v518_v15 = vld [vmem:[%s285_s25] sm:$0xff] (%p299_p0)   ;;  %v344_v18 = vld [vmem:[%s285_s25 + $0x8] sm:$0xf] (%p299_p0) }
  0x46   : > { %v519_v16 = vunpack.c.l.bf16 %v518_v15  ;;  %v520_v17 = vunpack.c.h.bf16 %v518_v15  ;;  %v347_v19 = vunpack.c.l.bf16 %v344_v18 }
  0x48   : > { %v348_v20 = vmul.f32 %v519_v16, %v519_v16  ;;  %v349_v21 = vmul.f32 %v520_v17, %v520_v17  ;;  %v350_v22 = vmul.f32 %v347_v19, %v347_v19 }
  0x4a   : > { %v352_v23 = vadd.f32 %v349_v21, %v348_v20 }
  0x4c   : > { %v353_v24 = vadd.f32 %v352_v23, %v350_v22 }
  0x4e   : > { %v354_v26 = vadd.f32 %v353_v24, %v351_v25 }
  0x50   : > { %355 = vst [vmem:[#allocation3] sm:$0xff] %v354_v26 }
  0x55   : > { %309 = vperm.xlu0 %613, %v305_v4  }
  0xcc   : > { %v319_v5 = vpop.xlane.xlu0 %318 }
  0xcd   : > { %v320_v6 = vsub.f32 %v304_v1, %v319_v5 }
  0xcf   : > { %v321_v7 = vmul.f32 1.442695, %v320_v6 }
  0xd1   : > { %614 = vpow2.f32 %v321_v7 }
  0xd4   : > { %v310_v10 = vpop.permute.xlu0 %309 }
  0xd5   : > { %vm311_vm2 = vcmp.eq.s32.totalorder %v307_v9, %v310_v10 }
  0xd6   : > { %v312_v12 = vsel %vm311_vm2, %v304_v1, 0.0 }
  0xd7   : > { %v314_v14 = vsel %vm313_vm1, %v312_v12, 0.0 }
  0xdb   : > { %v615_v11 = vpop.eup %614 }
  0xdc   : > { %v323_v13 = vsel %vm313_vm1, %v615_v11, 0.0 }
  0xdd   : > { %324 = vadd.xlane.f32.xlu1 %v323_v13 }
  0xe1   : > { %315 = vadd.xlane.f32.xlu1 %v314_v14 }
 0x16a   : > { %v325_v27 = vpop.xlane.xlu1 %324 }
 0x16b   : > { %616 = vlog2.f32 %v325_v27 }
 0x16e   : > { %v316_v33 = vpop.xlane.xlu1 %315 }
 0x175   : > { %v617_v30 = vpop.eup %616 }
 0x176   : > { %v327_v32 = vmul.f32 0.6931472, %v617_v30 }
 0x178   : > { %v328_v34 = vadd.f32 %v327_v32, %v319_v5 }
 0x17a   : > { %v335_v36 = vsub.f32 %v328_v34, %v316_v33 }
 0x17c   : > { %v336_v37 = vsel %vm334_vm3, %v335_v36, 0.0 }
 0x17d   : > { %v339_v38 = vadd.f32 %v337_v35, %v336_v37 }
 0x17f   : > { %341 = vst.msk [vmem:[#allocation2] sm:$0xff] %vm294_vm0, %v339_v38 }
 0x180 PF: > { %v372_v41 = vld [vmem:[#allocation3] sm:$0xff]  ;;  %s513_s5 = sshll.u32 %s743_s17, 4  ;;  %s400_s8 = sshll.u32 %s897_s26, 4  ;;  %s912_s8 = int_to_ptr.vmem [resolvable:$true] %s400_s8 }
 0x181   : > { %s910_s11 = scalar_lea.hbm %s969_s3, %s513_s5  ;;  %s388_s24 = scalar_lea.sflag [#allocation6], %s263_s4 }
 0x182   : > { %s648_s15 = scalar_lea.vmem %s912_s8, 16  ;;  %p982_p5 = scmp.ne.s32.totalorder %s975_s28, 0 }
 0x183   : > { %p649_p3 = scmp.ne.s32.totalorder %s912_s8, %s648_s15  ;;  %s756_s17 = smov [#allocation7]  }
 0x184   : > { %s652_s20 = sshll.u32 %s756_s17, 4  ;;  %s653_s20 = int_to_ptr.vmem [resolvable:$false] %s652_s20 }
 0x185   : > { %p650_p8 = pnand %p649_p3, %p982_p5  ;;  %s654_s21 = scalar_lea.vmem %s653_s20, 32 }
 0x186   : > { %v359_v39 = vld [vmem:[#allocation2] sm:$0xff]  ;;  %p655_p1 = scmp.lt.s32.totalorder %s912_s8, %s653_s20  ;;  %p656_p7 = scmp.lt.s32.totalorder %s654_s21, %s648_s15 }
 0x187   : > { %v361_v40 = vsel %vm294_vm0, %v359_v39, 0.0  ;;  %p651_p11 = pneg %p650_p8 }
 0x188   : > { %362 = vadd.xlane.f32.xlu0 %v361_v40  ;;  %p657_p9 = por %p656_p7, %p655_p1 }
 0x18a   : > { %p658_p10 = pnand %p657_p9, %p651_p11 }
 0x18c   : > { %373 = vadd.xlane.f32.xlu0 %v372_v41 }
 0x215   : > { %v363_v42 = vpop.xlane.xlu0 %362 }
 0x216   : > { %v364_v43 = vrot.slane %v363_v42, 4 }
 0x218   : > { %v365_v44 = vadd.f32 %v364_v43, %v363_v42 }
 0x219   : > { %v374_v45 = vpop.xlane.xlu0 %373 }
 0x21a   : > { %v366_v46 = vrot.slane %v365_v44, 2  ;;  %v375_v47 = vrot.slane %v374_v45, 4 }
 0x21c   : > { %v376_v48 = vadd.f32 %v375_v47, %v374_v45  ;;  %v367_v49 = vadd.f32 %v366_v46, %v365_v44 }
 0x21e   : > { %v377_v50 = vrot.slane %v376_v48, 2  ;;  %v368_v51 = vrot.slane %v367_v49, 1 }
 0x220   : > { %v378_v52 = vadd.f32 %v377_v50, %v376_v48  ;;  %v369_v53 = vadd.f32 %v368_v51, %v367_v49 }
 0x222   : > { %521 = vpush %v369_v53  ;;  %v379_v54 = vrot.slane %v378_v52, 1 }
 0x224   : > { %v380_v55 = vadd.f32 %v379_v54, %v378_v52 }
 0x226   : > { %523 = vpush %v380_v55 }
 0x253   : > { %s522_s6 = spop %521 }
 0x254   : > { %v371_v56 = vstv %s522_s6 }
 0x255   : > { %v383_v58 = vmul.f32 0.125, %v371_v56 }
 0x257   : > { %s524_s7 = spop %523 }
 0x258   : > { %v382_v57 = vstv %s524_s7 }
 0x259   : > { %v384_v59 = vmul.f32 5e-06, %v382_v57 }
 0x25b   : > { %v385_v60 = vadd.f32 %v384_v59, %v383_v58 }
 0x25d   : > { %386 = vst [vmem:[%s897_s26] sm:$0x1] %v385_v60 }
 0x25e   : > { %661 = shalt.err (!%p658_p10)
}
 0x25f   : > { %s662_s4 = scalar_lea.hbm %s910_s11, 16  ;;  %s666_s26 = scalar_lea.hbm %s969_s3, 32 }
 0x260   : > { %p663_p13 = scmp.ne.s32.totalorder %s910_s11, %s662_s4  ;;  %p667_p12 = scmp.lt.u32.totalorder %s910_s11, %s969_s3 }
 0x261   : > { %p668_p0 = scmp.lt.u32.totalorder %s666_s26, %s662_s4  ;;  %p670_p3 = scmp.lt.u32.totalorder %s662_s4, %s910_s11 }
 0x262   : > { %p664_p4 = pnand %p663_p13, %p982_p5 }
 0x263   : > { %p669_p2 = por %p668_p0, %p667_p12 }
 0x264   : > { %p665_p6 = pneg %p664_p4 }
 0x265   : > { %p671_p8 = por %p670_p3, %p669_p2 }
 0x267   : > { %p672_p11 = pnand %p671_p8, %p665_p6 }
 0x269   : > { %675 = shalt.err (!%p672_p11)
}
 0x26a   : > { %527 = dma.vmem_to_hbm [thread:$0]  (%p982_p5), %s912_s8, 16, %s910_s11, %s388_s24  }
 0x26b PF: > { %s412_s7 = sand.u32 1, %s723_s12   ;;  %p983_p1 = scmp.ne.s32.totalorder %s976_s29, 0 }
 0x26c   : > { %p984_p7 = scmp.ge.s32.totalorder %s751_s19, 2  ;;  %s413_s5 = scalar_lea.sflag [#allocation6], %s412_s7 }
 0x26e   : > { %p534_p9 = pnand %p984_p7, %p983_p1 }
 0x270   : > { %717 = dma.done.wait (!%p534_p9), %s413_s5, 16  }
 0x271   : > { %719 = vsyncadd (!%p534_p9), %s413_s5, 4294967280  ;;  %s19_s19 = sadd.s32 1, %s751_s19   ;;  %s985_s12 = smov %s727_s13 }
 0x272   : > { %p16_p10 = scmp.ge.s32.totalorder %s19_s19, 4   ;;  %s986_s13 = smov %s731_s14 }
 0x273   : > { %s987_s14 = smov %s835_s27  ;;  %s988_s15 = smov %s739_s16 }
 0x274   : > { %s956_s16 = smov 0   ;;  %s989_s17 = smov %s747_s18 }
 0x275   : > { %s990_s18 = smov %s992_s22  ;;  %18 = sbr.rel (!%p16_p10) target bundleno = 7 (0x7), region = 95 }
 0x27c   :  { %417 = vsyncpa [#allocation5], 1 }
 0x27d   :  { %419 = vsyncpa [#allocation5 + $0x1], 1 }
 0x27e   :  { %420 = vsyncpa [#allocation6], 1 }
 0x27f   :  { %422 = vsyncpa [#allocation6 + $0x1], 1 }

</bundles_post_ra>
